<compile_context>
chip_gen: v7x
topology: tpu7x:2x2x1
jax: 0.10.0
libtpu: 0.0.40
codegen_flags: <defaults>
</compile_context>

<pallas_src>
import math

import jax
import jax.numpy as jnp
from jax.experimental import pallas as pl
from jax.experimental.pallas import tpu as pltpu

_LANE = 128
_SUBLANE = 8
_ROW_ALIGN = 16                 # covers f32 (8,128) and bf16 (16,128) tiles
_TARGET_BLOCK_BYTES = 1 << 20   # ~1 MiB per streamed input per grid step


def _round_up(x, m):
    return ((x + m - 1) // m) * m


def _num_tensorcores():
    """Parallel split only pays off on multi-TensorCore chips (v7x)."""
    try:
        return max(1, min(2, int(getattr(jax.devices()[0], "num_cores", 1))))
    except Exception:  # pragma: no cover - defensive
        return 1


# ----------------------------------------------------------------------------
# Kernels.  grid = (n_par "parallel", steps "arbitrary").  Each parallel slice
# keeps a single (8,128) f32 accumulator vreg-tile and writes one partial tile
# at its last step; the wrapper sums the partials.
# ----------------------------------------------------------------------------
def _sumsq_kernel(x_ref, o_ref, acc_ref):
    """sum(x^2) over pre-scaled residual slab (weights already folded in)."""
    @pl.when(pl.program_id(1) == 0)
    def _():
        acc_ref[...] = jnp.zeros_like(acc_ref)

    x = x_ref[...].astype(jnp.float32)
    acc_ref[...] += jnp.sum((x * x).reshape(-1, _SUBLANE, _LANE), axis=0)

    @pl.when(pl.program_id(1) == pl.num_programs(1) - 1)
    def _():
        o_ref[...] = acc_ref[...]


def _absdiff_sum_kernel(a_ref, b_ref, o_ref, acc_ref):
    """sum(|a - b|) over pre-scaled slabs (weights already folded in)."""
    @pl.when(pl.program_id(1) == 0)
    def _():
        acc_ref[...] = jnp.zeros_like(acc_ref)

    d = a_ref[...].astype(jnp.float32) - b_ref[...].astype(jnp.float32)
    acc_ref[...] += jnp.sum(jnp.abs(d).reshape(-1, _SUBLANE, _LANE), axis=0)

    @pl.when(pl.program_id(1) == pl.num_programs(1) - 1)
    def _():
        o_ref[...] = acc_ref[...]


# ----------------------------------------------------------------------------
# Tiling / slab helpers.
# ----------------------------------------------------------------------------
def _choose_tiling(rows, dtype):
    """Pick (block_rows, padded_rows, n_parallel, steps_per_parallel)."""
    bytes_per_row = _LANE * jnp.dtype(dtype).itemsize
    max_rows = max(_ROW_ALIGN,
                   (_TARGET_BLOCK_BYTES // bytes_per_row) // _ROW_ALIGN * _ROW_ALIGN)
    block_rows = min(max_rows, _round_up(rows, _ROW_ALIGN))
    blocks = pl.cdiv(rows, block_rows)
    n_cores = _num_tensorcores()
    n_par = n_cores if blocks >= n_cores else 1
    blocks = _round_up(blocks, n_par)
    return block_rows, blocks * block_rows, n_par, blocks // n_par


def _slab_dtype(tensors):
    if all(jnp.asarray(t).dtype == jnp.bfloat16 for t in tensors):
        return jnp.bfloat16
    return jnp.float32


def _scaled_rows(x, scale, shift, dtype):
    """(f32(x) + shift) * scale, flattened and zero-padded to 128-lane rows."""
    flat = jnp.asarray(x, jnp.float32).reshape(-1)
    n = flat.shape[0]
    rows = pl.cdiv(n, _LANE)
    flat = (flat + shift) * jnp.float32(scale)
    flat = jnp.pad(flat, (0, rows * _LANE - n))          # zero -> 0 contribution
    return flat.reshape(rows, _LANE).astype(dtype), n, rows


# ----------------------------------------------------------------------------
# Pallas-call wrappers.
# ----------------------------------------------------------------------------
def _sumsq(data):
    rows = data.shape[0]
    block_rows, rows_p, n_par, steps = _choose_tiling(rows, data.dtype)
    data = jnp.pad(data, ((0, rows_p - rows), (0, 0)))   # zero rows contribute 0
    partials = pl.pallas_call(
        _sumsq_kernel,
        out_shape=jax.ShapeDtypeStruct((n_par * _SUBLANE, _LANE), jnp.float32),
        grid_spec=pltpu.PrefetchScalarGridSpec(
            num_scalar_prefetch=0,
            grid=(n_par, steps),
            in_specs=[
                pl.BlockSpec((block_rows, _LANE),
                             lambda p, s: (p * steps + s, 0)),
            ],
            out_specs=pl.BlockSpec((_SUBLANE, _LANE), lambda p, s: (p, 0)),
            scratch_shapes=[pltpu.VMEM((_SUBLANE, _LANE), jnp.float32)],
        ),
        compiler_params=pltpu.CompilerParams(
            dimension_semantics=("parallel", "arbitrary")),
    )(data)
    return jnp.sum(partials)


def _absdiff_sum(a, b):
    rows = a.shape[0]
    block_rows, rows_p, n_par, steps = _choose_tiling(rows, a.dtype)
    a = jnp.pad(a, ((0, rows_p - rows), (0, 0)))
    b = jnp.pad(b, ((0, rows_p - rows), (0, 0)))
    partials = pl.pallas_call(
        _absdiff_sum_kernel,
        out_shape=jax.ShapeDtypeStruct((n_par * _SUBLANE, _LANE), jnp.float32),
        grid_spec=pltpu.PrefetchScalarGridSpec(
            num_scalar_prefetch=0,
            grid=(n_par, steps),
            in_specs=[
                pl.BlockSpec((block_rows, _LANE),
                             lambda p, s: (p * steps + s, 0)),
                pl.BlockSpec((block_rows, _LANE),
                             lambda p, s: (p * steps + s, 0)),
            ],
            out_specs=pl.BlockSpec((_SUBLANE, _LANE), lambda p, s: (p, 0)),
            scratch_shapes=[pltpu.VMEM((_SUBLANE, _LANE), jnp.float32)],
        ),
        compiler_params=pltpu.CompilerParams(
            dimension_semantics=("parallel", "arbitrary")),
    )(a, b)
    return jnp.sum(partials)


# ----------------------------------------------------------------------------
# Loss pieces (each is ONE fused Pallas reduction).
# ----------------------------------------------------------------------------
def generator_loss(pr_audio_finals):
    """sum_t mean((t - 1)^2) over all discriminator finals, one pallas_call.

    Slab carries sqrt(1/n_t)*(t - 1); kernel sums squares.
    """
    dtype = _slab_dtype(pr_audio_finals)
    pieces = []
    for t in pr_audio_finals:
        n = 1
        for d in jnp.asarray(t).shape:
            n *= int(d)
        rows2d, _, _ = _scaled_rows(t, math.sqrt(1.0 / n), -1.0, dtype)
        pieces.append(rows2d)
    data = jnp.concatenate(pieces, axis=0)
    return _sumsq(data)


def _fused_l1_mean_sum(pairs):
    """sum over (g, p) pairs of mean(|g - p|), one pallas_call.

    Both slabs carry (1/n_t)*x so the kernel is a plain sum of |a - b|.
    """
    dtype = _slab_dtype([t for pair in pairs for t in pair])
    a_pieces, b_pieces = [], []
    for g, p in pairs:
        n = 1
        for d in jnp.asarray(g).shape:
            n *= int(d)
        w = 1.0 / n
        g2, _, _ = _scaled_rows(g, w, 0.0, dtype)
        p2, _, _ = _scaled_rows(p, w, 0.0, dtype)
        a_pieces.append(g2)
        b_pieces.append(p2)
    a = jnp.concatenate(a_pieces, axis=0)
    b = jnp.concatenate(b_pieces, axis=0)
    return _absdiff_sum(a, b)


def feature_loss(gt_states_list, pr_states_list):
    pairs = [(g, p)
             for gts, prs in zip(gt_states_list, pr_states_list)
             for g, p in zip(gts, prs)]
    return _fused_l1_mean_sum(pairs)


@jax.jit
def generator_loss_forward(mpd_output, msd_output, gt_spec, pr_spec):
    _, mpd_pr_finals, mpd_gt_states, mpd_pr_states = mpd_output
    _, msd_pr_finals, msd_gt_states, msd_pr_states = msd_output

    # adv_gen_loss = mpd_gen + msd_gen : all finals fused into ONE reduction.
    adv_gen_loss = generator_loss(list(mpd_pr_finals) + list(msd_pr_finals))

    # feature_loss = mpd_feat + msd_feat : all feature pairs in ONE reduction.
    pairs = []
    for gts, prs in zip(list(mpd_gt_states) + list(msd_gt_states),
                        list(mpd_pr_states) + list(msd_pr_states)):
        pairs.extend(zip(gts, prs))
    feat_loss = _fused_l1_mean_sum(pairs)

    # Mel L1 is reported on its own, so it gets its own (single) reduction.
    mel_loss = _fused_l1_mean_sum([(gt_spec, pr_spec)])

    loss = adv_gen_loss + 2.0 * feat_loss + 45.0 * mel_loss
    return {
        "gen_loss": loss,
        "adv_gen_loss": adv_gen_loss,
        "feature_loss": feat_loss,
        "mel_loss": mel_loss,
    }


# ----------------------------------------------------------------------------
# Pure-JAX reference for sanity checking.
# ----------------------------------------------------------------------------
def _ref_forward(mpd_output, msd_output, gt_spec, pr_spec):
    def gen(finals):
        return sum(jnp.mean((jnp.asarray(f, jnp.float32) - 1.0) ** 2)
                   for f in finals)

    def feat(gts, prs):
        return sum(
            jnp.mean(jnp.abs(jnp.asarray(g, jnp.float32)
                             - jnp.asarray(p, jnp.float32)))
            for gl, pl_ in zip(gts, prs)
            for g, p in zip(gl, pl_)
        )

    _, mpd_f, mpd_g, mpd_p = mpd_output
    _, msd_f, msd_g, msd_p = msd_output
    adv = gen(mpd_f) + gen(msd_f)
    fl = feat(mpd_g, mpd_p) + feat(msd_g, msd_p)
    mel = jnp.mean(jnp.abs(gt_spec - pr_spec))
    return {
        "gen_loss": adv + 2.0 * fl + 45.0 * mel,
        "adv_gen_loss": adv,
        "feature_loss": fl,
        "mel_loss": mel,
    }


if __name__ == "__main__":
    key = jax.random.PRNGKey(0)

    def nxt():
        global key
        key, sub = jax.random.split(key)
        return sub

    B = 2

    # --- MultiPeriodDiscriminator-like outputs: 2 sub-discriminators -------
    mpd_pr_finals = [
        jax.random.normal(nxt(), (B, 1, 50), jnp.float32),
        jax.random.normal(nxt(), (B, 1, 33), jnp.float32),
    ]
    mpd_gt_states = [
        [jax.random.normal(nxt(), (B, 4, 16, 3), jnp.float32) for _ in range(3)],
        [jax.random.normal(nxt(), (B, 4, 11, 5), jnp.float32) for _ in range(3)],
    ]
    mpd_pr_states = [
        [jax.random.normal(nxt(), (B, 4, 16, 3), jnp.float32) for _ in range(3)],
        [jax.random.normal(nxt(), (B, 4, 11, 5), jnp.float32) for _ in range(3)],
    ]
    mpd_gt_finals = [jnp.zeros_like(f) for f in mpd_pr_finals]  # unused slot
    mpd_output = (mpd_gt_finals, mpd_pr_finals, mpd_gt_states, mpd_pr_states)

    # --- MultiScaleDiscriminator-like outputs: 2 sub-discriminators --------
    msd_pr_finals = [
        jax.random.normal(nxt(), (B, 1, 64), jnp.float32),
        jax.random.normal(nxt(), (B, 1, 32), jnp.float32),
    ]
    msd_gt_states = [
        [jax.random.normal(nxt(), (B, 8, 32), jnp.float32) for _ in range(3)],
        [jax.random.normal(nxt(), (B, 8, 16), jnp.float32) for _ in range(3)],
    ]
    msd_pr_states = [
        [jax.random.normal(nxt(), (B, 8, 32), jnp.float32) for _ in range(3)],
        [jax.random.normal(nxt(), (B, 8, 16), jnp.float32) for _ in range(3)],
    ]
    msd_gt_finals = [jnp.zeros_like(f) for f in msd_pr_finals]  # unused slot
    msd_output = (msd_gt_finals, msd_pr_finals, msd_gt_states, msd_pr_states)

    # --- Mel spectrograms ---------------------------------------------------
    gt_spec = jax.random.normal(nxt(), (B, 80, 32), jnp.float32)
    pr_spec = gt_spec + 0.1 * jax.random.normal(nxt(), (B, 80, 32), jnp.float32)

    out = generator_loss_forward(mpd_output, msd_output, gt_spec, pr_spec)
    out = jax.tree_util.tree_map(jax.block_until_ready, out)

    ref = _ref_forward(mpd_output, msd_output, gt_spec, pr_spec)
    for k in ("gen_loss", "adv_gen_loss", "feature_loss", "mel_loss"):
        assert jnp.allclose(out[k], ref[k], rtol=1e-5, atol=1e-5), (k, out[k], ref[k])

    print("KERNEL_OK")
</pallas_src>

<mosaic_0001>
module attributes {stable_mosaic.version = 11 : i64} {
  func.func @_absdiff_sum_kernel(%arg0: i32, %arg1: i32, %arg2: memref<48x128xf32, #tpu.memory_space<vmem>>, %arg3: memref<48x128xf32, #tpu.memory_space<vmem>>, %arg4: memref<8x128xf32, #tpu.memory_space<vmem>>, %arg5: memref<8x128xf32, #tpu.memory_space<vmem>>) attributes {dimension_semantics = [#tpu.dimension_semantics<parallel>, #tpu.dimension_semantics<arbitrary>], iteration_bounds = array<i64: 1, 1>, scalar_prefetch = 0 : i64, scratch_operands = 1 : i64, tpu.core_type = #tpu.core_type<tc>, window_params = [{transform_indices = @transform_0, window_bounds = array<i64: 48, 128>}, {transform_indices = @transform_1, window_bounds = array<i64: 48, 128>}, {transform_indices = @transform_2, window_bounds = array<i64: 8, 128>}]} {
    %c0_i32 = arith.constant 0 : i32
    %0 = arith.cmpi eq, %arg1, %c0_i32 : i32
    %1 = arith.extui %0 : i1 to i32
    %c0_i32_0 = arith.constant 0 : i32
    %2 = arith.cmpi ne, %1, %c0_i32_0 : i32
    scf.if %2 {
      %cst_10 = arith.constant 0.000000e+00 : f32
      %15 = vector.broadcast %cst_10 : f32 to vector<8x128xf32>
      %c0_11 = arith.constant 0 : index
      %c0_12 = arith.constant 0 : index
      %16 = vector.load %arg5[%c0_11, %c0_12] : memref<8x128xf32, #tpu.memory_space<vmem>>, vector<8x128xf32>
      tpu.vector_store %arg5[%c0_11, %c0_12], %15 {strides = array<i32>} : memref<8x128xf32, #tpu.memory_space<vmem>>, vector<8x128xf32>,
    } else {
    }
    %c0 = arith.constant 0 : index
    %c0_1 = arith.constant 0 : index
    %3 = vector.load %arg2[%c0, %c0_1] : memref<48x128xf32, #tpu.memory_space<vmem>>, vector<48x128xf32>
    %c0_2 = arith.constant 0 : index
    %c0_3 = arith.constant 0 : index
    %4 = vector.load %arg3[%c0_2, %c0_3] : memref<48x128xf32, #tpu.memory_space<vmem>>, vector<48x128xf32>
    %5 = arith.subf %3, %4 : vector<48x128xf32>
    %c0_4 = arith.constant 0 : index
    %c0_5 = arith.constant 0 : index
    %6 = vector.load %arg5[%c0_4, %c0_5] : memref<8x128xf32, #tpu.memory_space<vmem>>, vector<8x128xf32>
    %7 = math.absf %5 : vector<48x128xf32>
    %8 = vector.shape_cast %7 : vector<48x128xf32> to vector<6x8x128xf32>
    %cst = arith.constant dense<0.000000e+00> : vector<8x128xf32>
    %9 = vector.multi_reduction <add>, %8, %cst [0] : vector<6x8x128xf32> to vector<8x128xf32>
    %10 = arith.addf %6, %9 : vector<8x128xf32>
    %c0_6 = arith.constant 0 : index
    %c0_7 = arith.constant 0 : index
    %11 = vector.load %arg5[%c0_6, %c0_7] : memref<8x128xf32, #tpu.memory_space<vmem>>, vector<8x128xf32>
    tpu.vector_store %arg5[%c0_6, %c0_7], %10 {strides = array<i32>} : memref<8x128xf32, #tpu.memory_space<vmem>>, vector<8x128xf32>,
    %c0_i32_8 = arith.constant 0 : i32
    %12 = arith.cmpi eq, %arg1, %c0_i32_8 : i32
    %13 = arith.extui %12 : i1 to i32
    %c0_i32_9 = arith.constant 0 : i32
    %14 = arith.cmpi ne, %13, %c0_i32_9 : i32
    scf.if %14 {
      %c0_10 = arith.constant 0 : index
      %c0_11 = arith.constant 0 : index
      %15 = vector.load %arg5[%c0_10, %c0_11] : memref<8x128xf32, #tpu.memory_space<vmem>>, vector<8x128xf32>
      %c0_12 = arith.constant 0 : index
      %c0_13 = arith.constant 0 : index
      %16 = vector.load %arg4[%c0_12, %c0_13] : memref<8x128xf32, #tpu.memory_space<vmem>>, vector<8x128xf32>
      tpu.vector_store %arg4[%c0_12, %c0_13], %15 {strides = array<i32>} : memref<8x128xf32, #tpu.memory_space<vmem>>, vector<8x128xf32>,
    } else {
    }
    return
  }
  func.func @transform_0(%arg0: i32, %arg1: i32) -> (i32, i32) {
    %c1_i32 = arith.constant 1 : i32
    %0 = arith.muli %arg0, %c1_i32 : i32
    %1 = arith.addi %0, %arg1 : i32
    %c0_i32 = arith.constant 0 : i32
    %c0_i32_0 = arith.constant 0 : i32
    return %1, %c0_i32 : i32, i32
  }
  func.func @transform_1(%arg0: i32, %arg1: i32) -> (i32, i32) {
    %c1_i32 = arith.constant 1 : i32
    %0 = arith.muli %arg0, %c1_i32 : i32
    %1 = arith.addi %0, %arg1 : i32
    %c0_i32 = arith.constant 0 : i32
    %c0_i32_0 = arith.constant 0 : i32
    return %1, %c0_i32 : i32, i32
  }
  func.func @transform_2(%arg0: i32, %arg1: i32) -> (i32, i32) {
    %c0_i32 = arith.constant 0 : i32
    %c0_i32_0 = arith.constant 0 : i32
    return %arg0, %c0_i32 : i32, i32
  }
}

module attributes {stable_mosaic.version = 11 : i64} {
  func.func @_sumsq_kernel(%arg0: i32, %arg1: i32, %arg2: memref<16x128xf32, #tpu.memory_space<vmem>>, %arg3: memref<8x128xf32, #tpu.memory_space<vmem>>, %arg4: memref<8x128xf32, #tpu.memory_space<vmem>>) attributes {dimension_semantics = [#tpu.dimension_semantics<parallel>, #tpu.dimension_semantics<arbitrary>], iteration_bounds = array<i64: 1, 1>, scalar_prefetch = 0 : i64, scratch_operands = 1 : i64, tpu.core_type = #tpu.core_type<tc>, window_params = [{transform_indices = @transform_0, window_bounds = array<i64: 16, 128>}, {transform_indices = @transform_1, window_bounds = array<i64: 8, 128>}]} {
    %c0_i32 = arith.constant 0 : i32
    %0 = arith.cmpi eq, %arg1, %c0_i32 : i32
    %1 = arith.extui %0 : i1 to i32
    %c0_i32_0 = arith.constant 0 : i32
    %2 = arith.cmpi ne, %1, %c0_i32_0 : i32
    scf.if %2 {
      %cst_8 = arith.constant 0.000000e+00 : f32
      %13 = vector.broadcast %cst_8 : f32 to vector<8x128xf32>
      %c0_9 = arith.constant 0 : index
      %c0_10 = arith.constant 0 : index
      %14 = vector.load %arg4[%c0_9, %c0_10] : memref<8x128xf32, #tpu.memory_space<vmem>>, vector<8x128xf32>
      tpu.vector_store %arg4[%c0_9, %c0_10], %13 {strides = array<i32>} : memref<8x128xf32, #tpu.memory_space<vmem>>, vector<8x128xf32>,
    } else {
    }
    %c0 = arith.constant 0 : index
    %c0_1 = arith.constant 0 : index
    %3 = vector.load %arg2[%c0, %c0_1] : memref<16x128xf32, #tpu.memory_space<vmem>>, vector<16x128xf32>
    %c0_2 = arith.constant 0 : index
    %c0_3 = arith.constant 0 : index
    %4 = vector.load %arg4[%c0_2, %c0_3] : memref<8x128xf32, #tpu.memory_space<vmem>>, vector<8x128xf32>
    %5 = arith.mulf %3, %3 : vector<16x128xf32>
    %6 = vector.shape_cast %5 : vector<16x128xf32> to vector<2x8x128xf32>
    %cst = arith.constant dense<0.000000e+00> : vector<8x128xf32>
    %7 = vector.multi_reduction <add>, %6, %cst [0] : vector<2x8x128xf32> to vector<8x128xf32>
    %8 = arith.addf %4, %7 : vector<8x128xf32>
    %c0_4 = arith.constant 0 : index
    %c0_5 = arith.constant 0 : index
    %9 = vector.load %arg4[%c0_4, %c0_5] : memref<8x128xf32, #tpu.memory_space<vmem>>, vector<8x128xf32>
    tpu.vector_store %arg4[%c0_4, %c0_5], %8 {strides = array<i32>} : memref<8x128xf32, #tpu.memory_space<vmem>>, vector<8x128xf32>,
    %c0_i32_6 = arith.constant 0 : i32
    %10 = arith.cmpi eq, %arg1, %c0_i32_6 : i32
    %11 = arith.extui %10 : i1 to i32
    %c0_i32_7 = arith.constant 0 : i32
    %12 = arith.cmpi ne, %11, %c0_i32_7 : i32
    scf.if %12 {
      %c0_8 = arith.constant 0 : index
      %c0_9 = arith.constant 0 : index
      %13 = vector.load %arg4[%c0_8, %c0_9] : memref<8x128xf32, #tpu.memory_space<vmem>>, vector<8x128xf32>
      %c0_10 = arith.constant 0 : index
      %c0_11 = arith.constant 0 : index
      %14 = vector.load %arg3[%c0_10, %c0_11] : memref<8x128xf32, #tpu.memory_space<vmem>>, vector<8x128xf32>
      tpu.vector_store %arg3[%c0_10, %c0_11], %13 {strides = array<i32>} : memref<8x128xf32, #tpu.memory_space<vmem>>, vector<8x128xf32>,
    } else {
    }
    return
  }
  func.func @transform_0(%arg0: i32, %arg1: i32) -> (i32, i32) {
    %c1_i32 = arith.constant 1 : i32
    %0 = arith.muli %arg0, %c1_i32 : i32
    %1 = arith.addi %0, %arg1 : i32
    %c0_i32 = arith.constant 0 : i32
    %c0_i32_0 = arith.constant 0 : i32
    return %1, %c0_i32 : i32, i32
  }
  func.func @transform_1(%arg0: i32, %arg1: i32) -> (i32, i32) {
    %c0_i32 = arith.constant 0 : i32
    %c0_i32_0 = arith.constant 0 : i32
    return %arg0, %c0_i32 : i32, i32
  }
}

</mosaic_0001>

<bundles_post_ra>
// kernel: generator_loss_forward.4
= control target key start
LH: loop header
LB: loop body
LE: loop exit
PB: predicated region body
PF: predicated region fallthrough
CT: control target
= control target key end

     0   :  { %s167_s0 = inlined_call_operand.vmem [shape: f32[48,128], index: 0, kind: input, shape index: {}]   ;;  %s168_s1 = inlined_call_operand.vmem [shape: f32[48,128], index: 1, kind: input, shape index: {}]   ;;  %s169_s2 = inlined_call_operand.vmem [shape: f32[8,128], index: 2, kind: output, shape index: {}]  }
   0x1   :  { %v60_v0 = vld [vmem:[%s167_s0] sm:$0xff]  ;;  %v61_v1 = vld [vmem:[%s167_s0 + $0x8] sm:$0xff]  ;;  %v62_v2 = vld [vmem:[%s167_s0 + $0x10] sm:$0xff] }
   0x2   :  { %v63_v3 = vld [vmem:[%s167_s0 + $0x18] sm:$0xff]  ;;  %v64_v4 = vld [vmem:[%s167_s0 + $0x20] sm:$0xff]  ;;  %v67_v6 = vld [vmem:[%s168_s1 + $0x8] sm:$0xff] }
   0x3   :  { %v66_v5 = vld [vmem:[%s168_s1] sm:$0xff]  ;;  %v68_v7 = vld [vmem:[%s168_s1 + $0x10] sm:$0xff]  ;;  %v69_v8 = vld [vmem:[%s168_s1 + $0x18] sm:$0xff]  ;;  %v73_v11 = vsub.f32 %v61_v1, %v67_v6 }
   0x4   :  { %v70_v9 = vld [vmem:[%s168_s1 + $0x20] sm:$0xff]  ;;  %v72_v10 = vsub.f32 %v60_v0, %v66_v5  ;;  %v74_v12 = vsub.f32 %v62_v2, %v68_v7  ;;  %v65_v13 = vld [vmem:[%s167_s0 + $0x28] sm:$0xff]  ;;  %v75_v15 = vsub.f32 %v63_v3, %v69_v8 }
   0x5   :  { %v71_v14 = vld [vmem:[%s168_s1 + $0x28] sm:$0xff]  ;;  %v76_v16 = vsub.f32 %v64_v4, %v70_v9  ;;  %v80_v18 = vand.u32 2147483647, %v73_v11 }
   0x6   :  { %v79_v17 = vand.u32 2147483647, %v72_v10  ;;  %v81_v19 = vand.u32 2147483647, %v74_v12  ;;  %v77_v20 = vsub.f32 %v65_v13, %v71_v14  ;;  %v82_v21 = vand.u32 2147483647, %v75_v15 }
   0x7   :  { %v83_v23 = vand.u32 2147483647, %v76_v16 }
   0x8   :  { %v85_v22 = vadd.f32 %v80_v18, %v79_v17  ;;  %v84_v25 = vand.u32 2147483647, %v77_v20 }
   0xa   :  { %v86_v24 = vadd.f32 %v85_v22, %v81_v19 }
   0xc   :  { %v87_v26 = vadd.f32 %v86_v24, %v82_v21 }
   0xe   :  { %v88_v27 = vadd.f32 %v87_v26, %v83_v23 }
  0x10   :  { %v89_v28 = vadd.f32 %v88_v27, %v84_v25 }
  0x12   :  { %96 = vst [vmem:[%s169_s2] sm:$0xff] %v89_v28 }

// kernel: generator_loss_forward.3
= control target key start
LH: loop header
LB: loop body
LE: loop exit
PB: predicated region body
PF: predicated region fallthrough
CT: control target
= control target key end

     0   :  { %s77_s0 = inlined_call_operand.vmem [shape: f32[16,128], index: 0, kind: input, shape index: {}]   ;;  %s78_s1 = inlined_call_operand.vmem [shape: f32[8,128], index: 1, kind: output, shape index: {}]  }
   0x1   :  { %v35_v0 = vld [vmem:[%s77_s0] sm:$0xff]  ;;  %v36_v1 = vld [vmem:[%s77_s0 + $0x8] sm:$0xff] }
   0x2   :  { %v38_v2 = vmul.f32 %v35_v0, %v35_v0  ;;  %v39_v3 = vmul.f32 %v36_v1, %v36_v1 }
   0x4   :  { %v40_v4 = vadd.f32 %v39_v3, %v38_v2 }
   0x6   :  { %47 = vst [vmem:[%s78_s1] sm:$0xff] %v40_v4 }

</bundles_post_ra>
